<compile_context>
chip_gen: v5e
topology: v5e:2x2
jax: 0.10.0
libtpu: 0.0.40
codegen_flags: <defaults>
</compile_context>

<pallas_src>
import functools
from typing import NamedTuple, Optional

import jax
import jax.numpy as jnp
from jax import lax
from jax.experimental import pallas as pl
from jax.experimental.pallas import tpu as pltpu


class SeqBatch(NamedTuple):
    user_ids: jnp.ndarray
    ids: jnp.ndarray
    ids_fut: jnp.ndarray
    x: jnp.ndarray
    x_fut: jnp.ndarray
    seq_mask: jnp.ndarray


class TokenizedSeqBatch(NamedTuple):
    user_ids: jnp.ndarray
    sem_ids: jnp.ndarray
    sem_ids_fut: Optional[jnp.ndarray]
    seq_mask: Optional[jnp.ndarray]
    token_type_ids: jnp.ndarray


def _silu(x):
    return x * jax.nn.sigmoid(x)


def _round_up(x, m):
    return ((x + m - 1) // m) * m


def _cdiv(a, b):
    return (a + b - 1) // b


def _tokenizer_kernel(x_ref, w0_ref, b0_ref, w1_ref, b1_ref, w2_ref, b2_ref,
                      cb_ek_ref, cb_ke_ref, cb_half_ref, ids_ref, *,
                      n_layers, codebook_size):
    """One row-tile: encoder MLP + residual quantization over n_layers codebooks."""
    rows = x_ref.shape[0]

    # --- encoder MLP (Linear + SiLU, last projection has no activation) ---
    # bf16 operands on the MXU, f32 accumulation; elementwise math stays in f32
    # (v5e VPU has no bf16).
    h = x_ref[...].astype(jnp.bfloat16)
    h = _silu(jnp.dot(h, w0_ref[...], preferred_element_type=jnp.float32)
              + b0_ref[...])
    h = _silu(jnp.dot(h.astype(jnp.bfloat16), w1_ref[...],
                      preferred_element_type=jnp.float32) + b1_ref[...])
    res = jnp.dot(h.astype(jnp.bfloat16), w2_ref[...],
                  preferred_element_type=jnp.float32) + b2_ref[...]          # (rows, E) f32

    k_iota = lax.broadcasted_iota(jnp.int32, (rows, codebook_size), 1)
    lane = lax.broadcasted_iota(jnp.int32, (rows, n_layers), 1)
    out = jnp.zeros((rows, n_layers), jnp.int32)

    # --- residual quantization (n_layers is static -> unrolled) ---
    for layer in range(n_layers):
        cb_ek = cb_ek_ref[layer]       # (E, K) bf16 -- pre-transposed, cross term
        cb_ke = cb_ke_ref[layer]       # (K, E) bf16 -- one-hot gather
        cb_half = cb_half_ref[layer]   # (1, K) f32  = 0.5*||c||^2 (host precomputed)

        # argmin_k ||r - c_k||^2 == argmin_k (0.5*||c_k||^2 - r . c_k)
        # NOTE: cross term uses bf16 operands (single MXU pass); near-ties may
        # differ from an f32 torch reference.
        cross = jnp.dot(res.astype(jnp.bfloat16), cb_ek,
                        preferred_element_type=jnp.float32)                  # (rows, K)
        proxy = cb_half - cross
        # argmin with first-index tie-break (matches torch.argmin)
        min_p = jnp.min(proxy, axis=-1, keepdims=True)
        ids = jnp.min(jnp.where(proxy <= min_p, k_iota, codebook_size),
                      axis=-1, keepdims=True)                                # (rows, 1) int32

        # gather selected embedding via one-hot matmul (single bf16 MXU pass);
        # f32 accumulation of a 0/1-weighted sum is exact, so the residual chain
        # is exact w.r.t. the bf16-rounded codebooks (chosen deliberately).
        onehot = (k_iota == ids).astype(jnp.bfloat16)                        # (rows, K)
        emb = jnp.dot(onehot, cb_ke, preferred_element_type=jnp.float32)
        res = res - emb

        out = jnp.where(lane == layer, ids, out)

    ids_ref[...] = out                                                       # (rows, n_layers)


def rq_semantic_ids(x_flat, ws, bs, codebooks, *, tile_rows=1024):
    """x_flat: (R, input_dim). Returns int32 (R, n_layers)."""
    R, Din = x_flat.shape
    n_layers, K, E = codebooks.shape
    (w0, w1, w2), (b0, b1, b2) = ws, bs
    H0, H1 = w0.shape[1], w1.shape[1]

    # --- row tiling: bounded padding (<8 wasted rows per tile) and >=2 tiles
    # whenever possible (v7x megacore sharding of the "parallel" axis). ---
    R8 = _round_up(R, 8)
    n_tiles = max(_cdiv(R8, tile_rows), min(2, R8 // 8), 1)
    tile = _round_up(_cdiv(R8, n_tiles), 8)
    R_pad = n_tiles * tile
    if R_pad != R:
        x_flat = jnp.pad(x_flat, ((0, R_pad - R), (0, 0)))

    # bf16 weights / codebooks for the MXU.  (L, E, K) transposed copy feeds the
    # cross term without in-kernel XLU transposes; (L, K, E) copy feeds the
    # one-hot gather.  Half-squared-norms precomputed in f32 on the host side.
    w0b, w1b, w2b = (w.astype(jnp.bfloat16) for w in (w0, w1, w2))
    cb_ke = codebooks.astype(jnp.bfloat16)                                   # (L, K, E)
    cb_ek = jnp.swapaxes(cb_ke, -1, -2)                                      # (L, E, K)
    cb_half = 0.5 * jnp.sum(codebooks * codebooks, axis=-1)[:, None, :]      # (L, 1, K)

    # Grid-invariant operands: single-buffered (they are DMA'd once anyway).
    invariant = functools.partial(pl.BlockSpec, pipeline_mode=pl.Buffered(1))

    # Explicit VMEM budget (double-buffered x/out tiles + single-buffered rest).
    est = (2 * tile * Din * x_flat.dtype.itemsize
           + 2 * tile * n_layers * 4
           + (Din * H0 + H0 * H1 + H1 * E) * 2
           + (H0 + H1 + E) * 4
           + 2 * n_layers * K * E * 2
           + n_layers * K * 4)
    vmem_limit = int(min(64 * 1024 * 1024, max(16 * 1024 * 1024, 2 * est)))

    kernel = functools.partial(_tokenizer_kernel,
                               n_layers=n_layers, codebook_size=K)
    out_padded = pl.pallas_call(
        kernel,
        out_shape=jax.ShapeDtypeStruct((R_pad, n_layers), jnp.int32),
        grid_spec=pltpu.PrefetchScalarGridSpec(
            num_scalar_prefetch=0,
            grid=(n_tiles,),
            in_specs=[
                pl.BlockSpec((tile, Din), lambda i: (i, 0)),
                invariant((Din, H0), lambda i: (0, 0)),
                invariant((1, H0), lambda i: (0, 0)),
                invariant((H0, H1), lambda i: (0, 0)),
                invariant((1, H1), lambda i: (0, 0)),
                invariant((H1, E), lambda i: (0, 0)),
                invariant((1, E), lambda i: (0, 0)),
                invariant((n_layers, E, K), lambda i: (0, 0, 0)),
                invariant((n_layers, K, E), lambda i: (0, 0, 0)),
                invariant((n_layers, 1, K), lambda i: (0, 0, 0)),
            ],
            out_specs=pl.BlockSpec((tile, n_layers), lambda i: (i, 0)),
        ),
        compiler_params=pltpu.CompilerParams(
            dimension_semantics=("parallel",),
            vmem_limit_bytes=vmem_limit),
    )(x_flat, w0b, b0, w1b, b1, w2b, b2, cb_ek, cb_ke, cb_half)

    return out_padded if R_pad == R else out_padded[:R]


def semantic_id_tokenizer_forward(batch: SeqBatch, ws, bs, codebooks):
    """Equivalent of SemanticIdTokenizer.forward with an empty cache."""
    B, N = batch.ids.shape
    n_layers = codebooks.shape[0]
    x_flat = batch.x.reshape(B * N, batch.x.shape[-1])
    sem_ids_flat = rq_semantic_ids(x_flat, ws, bs, codebooks)                # (B*N, L)
    sem_ids = sem_ids_flat.reshape(B, N * n_layers)
    D = n_layers
    token_type_ids = jnp.tile(jnp.arange(D, dtype=jnp.int32), (B, N))        # (B, N*D)
    # TODO(synk): cached-corpus branch (precompute_corpus_ids / dedup dim /
    # cached-id lookup) is a host-side table build + lookup, not implemented here.
    return TokenizedSeqBatch(user_ids=batch.user_ids,
                             sem_ids=sem_ids,
                             sem_ids_fut=None,
                             seq_mask=None,
                             token_type_ids=token_type_ids)


def init_params(key, input_dim, hidden_dims, embed_dim, codebook_size, n_layers):
    dims = [input_dim] + list(hidden_dims) + [embed_dim]
    keys = jax.random.split(key, 2 * (len(dims) - 1) + 1)
    ws, bs = [], []
    for i, (din, dout) in enumerate(zip(dims[:-1], dims[1:])):
        bound = 1.0 / (din ** 0.5)
        ws.append(jax.random.uniform(keys[2 * i], (din, dout), jnp.float32,
                                     -bound, bound))
        bs.append(jax.random.uniform(keys[2 * i + 1], (1, dout), jnp.float32,
                                     -bound, bound))
    codebooks = jax.random.normal(keys[-1], (n_layers, codebook_size, embed_dim),
                                  jnp.float32)
    return ws, bs, codebooks


if __name__ == "__main__":
    key = jax.random.PRNGKey(0)
    k_par, k_x = jax.random.split(key)

    # Small, module-consistent shapes.
    B, N = 2, 8                      # batch of sequences, seq length
    input_dim = 64                   # item feature dim
    hidden_dims = [128, 64]          # encoder hidden dims
    embed_dim = 32                   # RQ-VAE embedding dim (output_dim)
    codebook_size = 128
    n_layers = 3

    ws, bs, codebooks = init_params(k_par, input_dim, hidden_dims, embed_dim,
                                    codebook_size, n_layers)

    x = jax.random.normal(k_x, (B, N, input_dim), jnp.float32)
    ids = jnp.arange(B * N, dtype=jnp.int32).reshape(B, N)
    batch = SeqBatch(
        user_ids=jnp.arange(B, dtype=jnp.int32),
        ids=ids,
        ids_fut=ids[:, :1],
        x=x,
        x_fut=x[:, :1, :],
        seq_mask=jnp.ones((B, N), dtype=bool),
    )

    out = semantic_id_tokenizer_forward(batch, ws, bs, codebooks)
    jax.block_until_ready(out.sem_ids)
    jax.block_until_ready(out.token_type_ids)

    assert out.sem_ids.shape == (B, N * n_layers)
    assert out.sem_ids.dtype == jnp.int32
    assert bool(jnp.all(out.sem_ids >= 0)) and bool(jnp.all(out.sem_ids < codebook_size))
    assert out.token_type_ids.shape == (B, N * n_layers)
    print("KERNEL_OK")
</pallas_src>

<mosaic_0001>
module attributes {stable_mosaic.version = 11 : i64} {
  func.func @_tokenizer_kernel(%arg0: i32, %arg1: memref<8x64xf32, #tpu.memory_space<vmem>>, %arg2: memref<64x128xbf16, #tpu.memory_space<vmem>>, %arg3: memref<1x128xf32, #tpu.memory_space<vmem>>, %arg4: memref<128x64xbf16, #tpu.memory_space<vmem>>, %arg5: memref<1x64xf32, #tpu.memory_space<vmem>>, %arg6: memref<64x32xbf16, #tpu.memory_space<vmem>>, %arg7: memref<1x32xf32, #tpu.memory_space<vmem>>, %arg8: memref<3x32x128xbf16, #tpu.memory_space<vmem>>, %arg9: memref<3x128x32xbf16, #tpu.memory_space<vmem>>, %arg10: memref<3x1x128xf32, #tpu.memory_space<vmem>>, %arg11: memref<8x3xi32, #tpu.memory_space<vmem>>) attributes {dimension_semantics = [#tpu.dimension_semantics<parallel>], iteration_bounds = array<i64: 2>, scalar_prefetch = 0 : i64, scratch_operands = 0 : i64, tpu.core_type = #tpu.core_type<tc>, window_params = [{transform_indices = @transform_0, window_bounds = array<i64: 8, 64>}, {pipeline_mode = #tpu.pipeline_mode<synchronous>, transform_indices = @transform_1, window_bounds = array<i64: 64, 128>}, {pipeline_mode = #tpu.pipeline_mode<synchronous>, transform_indices = @transform_2, window_bounds = array<i64: 1, 128>}, {pipeline_mode = #tpu.pipeline_mode<synchronous>, transform_indices = @transform_3, window_bounds = array<i64: 128, 64>}, {pipeline_mode = #tpu.pipeline_mode<synchronous>, transform_indices = @transform_4, window_bounds = array<i64: 1, 64>}, {pipeline_mode = #tpu.pipeline_mode<synchronous>, transform_indices = @transform_5, window_bounds = array<i64: 64, 32>}, {pipeline_mode = #tpu.pipeline_mode<synchronous>, transform_indices = @transform_6, window_bounds = array<i64: 1, 32>}, {pipeline_mode = #tpu.pipeline_mode<synchronous>, transform_indices = @transform_7, window_bounds = array<i64: 3, 32, 128>}, {pipeline_mode = #tpu.pipeline_mode<synchronous>, transform_indices = @transform_8, window_bounds = array<i64: 3, 128, 32>}, {pipeline_mode = #tpu.pipeline_mode<synchronous>, transform_indices = @transform_9, window_bounds = array<i64: 3, 1, 128>}, {transform_indices = @transform_10, window_bounds = array<i64: 8, 3>}]} {
    %c0 = arith.constant 0 : index
    %c0_0 = arith.constant 0 : index
    %0 = vector.load %arg1[%c0, %c0_0] : memref<8x64xf32, #tpu.memory_space<vmem>>, vector<8x64xf32>
    %1 = arith.truncf %0 : vector<8x64xf32> to vector<8x64xbf16>
    %c0_1 = arith.constant 0 : index
    %c0_2 = arith.constant 0 : index
    %2 = vector.load %arg2[%c0_1, %c0_2] : memref<64x128xbf16, #tpu.memory_space<vmem>>, vector<64x128xbf16>
    %cst = arith.constant dense<0.000000e+00> : vector<8x128xf32>
    %3 = tpu.matmul %1, %2, %cst {dimension_numbers = #tpu.dot_dimension_numbers<[1], [0], [0], [1], [0, 0, 1, 1], [], []>} : vector<8x64xbf16>, vector<64x128xbf16>, vector<8x128xf32> -> vector<8x128xf32>
    %c0_3 = arith.constant 0 : index
    %c0_4 = arith.constant 0 : index
    %4 = vector.load %arg3[%c0_3, %c0_4] : memref<1x128xf32, #tpu.memory_space<vmem>>, vector<1x128xf32>
    %5 = vector.broadcast %4 : vector<1x128xf32> to vector<8x128xf32>
    %6 = arith.addf %3, %5 : vector<8x128xf32>
    %7 = arith.negf %6 : vector<8x128xf32>
    %8 = math.exp %7 : vector<8x128xf32>
    %cst_5 = arith.constant 1.000000e+00 : f32
    %9 = vector.broadcast %cst_5 : f32 to vector<8x128xf32>
    %10 = arith.addf %9, %8 : vector<8x128xf32>
    %11 = arith.divf %9, %10 : vector<8x128xf32>
    %12 = arith.mulf %6, %11 : vector<8x128xf32>
    %13 = arith.truncf %12 : vector<8x128xf32> to vector<8x128xbf16>
    %c0_6 = arith.constant 0 : index
    %c0_7 = arith.constant 0 : index
    %14 = vector.load %arg4[%c0_6, %c0_7] : memref<128x64xbf16, #tpu.memory_space<vmem>>, vector<128x64xbf16>
    %cst_8 = arith.constant dense<0.000000e+00> : vector<8x64xf32>
    %15 = tpu.matmul %13, %14, %cst_8 {dimension_numbers = #tpu.dot_dimension_numbers<[1], [0], [0], [1], [0, 0, 1, 1], [], []>} : vector<8x128xbf16>, vector<128x64xbf16>, vector<8x64xf32> -> vector<8x64xf32>
    %c0_9 = arith.constant 0 : index
    %c0_10 = arith.constant 0 : index
    %16 = vector.load %arg5[%c0_9, %c0_10] : memref<1x64xf32, #tpu.memory_space<vmem>>, vector<1x64xf32>
    %17 = vector.broadcast %16 : vector<1x64xf32> to vector<8x64xf32>
    %18 = arith.addf %15, %17 : vector<8x64xf32>
    %19 = arith.negf %18 : vector<8x64xf32>
    %20 = math.exp %19 : vector<8x64xf32>
    %cst_11 = arith.constant 1.000000e+00 : f32
    %21 = vector.broadcast %cst_11 : f32 to vector<8x64xf32>
    %22 = arith.addf %21, %20 : vector<8x64xf32>
    %23 = arith.divf %21, %22 : vector<8x64xf32>
    %24 = arith.mulf %18, %23 : vector<8x64xf32>
    %25 = arith.truncf %24 : vector<8x64xf32> to vector<8x64xbf16>
    %c0_12 = arith.constant 0 : index
    %c0_13 = arith.constant 0 : index
    %26 = vector.load %arg6[%c0_12, %c0_13] : memref<64x32xbf16, #tpu.memory_space<vmem>>, vector<64x32xbf16>
    %cst_14 = arith.constant dense<0.000000e+00> : vector<8x32xf32>
    %27 = tpu.matmul %25, %26, %cst_14 {dimension_numbers = #tpu.dot_dimension_numbers<[1], [0], [0], [1], [0, 0, 1, 1], [], []>} : vector<8x64xbf16>, vector<64x32xbf16>, vector<8x32xf32> -> vector<8x32xf32>
    %c0_15 = arith.constant 0 : index
    %c0_16 = arith.constant 0 : index
    %28 = vector.load %arg7[%c0_15, %c0_16] : memref<1x32xf32, #tpu.memory_space<vmem>>, vector<1x32xf32>
    %29 = vector.broadcast %28 : vector<1x32xf32> to vector<8x32xf32>
    %30 = arith.addf %27, %29 : vector<8x32xf32>
    %31 = tpu.iota {dimensions = array<i32: 1>} : vector<8x128xi32>
    %32 = tpu.iota {dimensions = array<i32: 1>} : vector<8x3xi32>
    %c0_i32 = arith.constant 0 : i32
    %33 = vector.broadcast %c0_i32 : i32 to vector<8x3xi32>
    %c0_17 = arith.constant 0 : index
    %c0_18 = arith.constant 0 : index
    %c0_19 = arith.constant 0 : index
    %34 = vector.load %arg8[%c0_17, %c0_18, %c0_19] : memref<3x32x128xbf16, #tpu.memory_space<vmem>>, vector<1x32x128xbf16>
    %35 = vector.shape_cast %34 : vector<1x32x128xbf16> to vector<32x128xbf16>
    %c0_20 = arith.constant 0 : index
    %c0_21 = arith.constant 0 : index
    %c0_22 = arith.constant 0 : index
    %36 = vector.load %arg9[%c0_20, %c0_21, %c0_22] : memref<3x128x32xbf16, #tpu.memory_space<vmem>>, vector<1x128x32xbf16>
    %37 = vector.shape_cast %36 : vector<1x128x32xbf16> to vector<128x32xbf16>
    %c0_23 = arith.constant 0 : index
    %c0_24 = arith.constant 0 : index
    %c0_25 = arith.constant 0 : index
    %38 = vector.load %arg10[%c0_23, %c0_24, %c0_25] : memref<3x1x128xf32, #tpu.memory_space<vmem>>, vector<1x1x128xf32>
    %39 = vector.shape_cast %38 : vector<1x1x128xf32> to vector<1x128xf32>
    %40 = arith.truncf %30 : vector<8x32xf32> to vector<8x32xbf16>
    %cst_26 = arith.constant dense<0.000000e+00> : vector<8x128xf32>
    %41 = tpu.matmul %40, %35, %cst_26 {dimension_numbers = #tpu.dot_dimension_numbers<[1], [0], [0], [1], [0, 0, 1, 1], [], []>} : vector<8x32xbf16>, vector<32x128xbf16>, vector<8x128xf32> -> vector<8x128xf32>
    %42 = vector.broadcast %39 : vector<1x128xf32> to vector<8x128xf32>
    %43 = arith.subf %42, %41 : vector<8x128xf32>
    %cst_27 = arith.constant dense<0x7F800000> : vector<8xf32>
    %44 = vector.multi_reduction <minimumf>, %43, %cst_27 [1] : vector<8x128xf32> to vector<8xf32>
    %45 = vector.shape_cast %44 : vector<8xf32> to vector<8x1xf32>
    %46 = vector.broadcast %45 : vector<8x1xf32> to vector<8x128xf32>
    %47 = arith.cmpf ole, %43, %46 : vector<8x128xf32>
    %c128_i32 = arith.constant 128 : i32
    %48 = vector.broadcast %c128_i32 : i32 to vector<8x128xi32>
    %49 = arith.select %47, %31, %48 : vector<8x128xi1>, vector<8x128xi32>
    %cst_28 = arith.constant dense<2147483647> : vector<8xi32>
    %50 = vector.multi_reduction <minsi>, %49, %cst_28 [1] : vector<8x128xi32> to vector<8xi32>
    %51 = vector.shape_cast %50 : vector<8xi32> to vector<8x1xi32>
    %52 = vector.broadcast %51 : vector<8x1xi32> to vector<8x128xi32>
    %53 = arith.cmpi eq, %31, %52 : vector<8x128xi32>
    %54 = arith.extui %53 : vector<8x128xi1> to vector<8x128xi32>
    %55 = arith.sitofp %54 : vector<8x128xi32> to vector<8x128xf32>
    %56 = arith.truncf %55 : vector<8x128xf32> to vector<8x128xbf16>
    %cst_29 = arith.constant dense<0.000000e+00> : vector<8x32xf32>
    %57 = tpu.matmul %56, %37, %cst_29 {dimension_numbers = #tpu.dot_dimension_numbers<[1], [0], [0], [1], [0, 0, 1, 1], [], []>} : vector<8x128xbf16>, vector<128x32xbf16>, vector<8x32xf32> -> vector<8x32xf32>
    %58 = arith.subf %30, %57 : vector<8x32xf32>
    %c0_i32_30 = arith.constant 0 : i32
    %59 = vector.broadcast %c0_i32_30 : i32 to vector<8x3xi32>
    %60 = arith.cmpi eq, %32, %59 : vector<8x3xi32>
    %61 = vector.shape_cast %51 : vector<8x1xi32> to vector<8x1xi32>
    %62 = vector.broadcast %61 : vector<8x1xi32> to vector<8x3xi32>
    %63 = arith.select %60, %62, %33 : vector<8x3xi1>, vector<8x3xi32>
    %c1 = arith.constant 1 : index
    %c0_31 = arith.constant 0 : index
    %c0_32 = arith.constant 0 : index
    %64 = vector.load %arg8[%c1, %c0_31, %c0_32] : memref<3x32x128xbf16, #tpu.memory_space<vmem>>, vector<1x32x128xbf16>
    %65 = vector.shape_cast %64 : vector<1x32x128xbf16> to vector<32x128xbf16>
    %c1_33 = arith.constant 1 : index
    %c0_34 = arith.constant 0 : index
    %c0_35 = arith.constant 0 : index
    %66 = vector.load %arg9[%c1_33, %c0_34, %c0_35] : memref<3x128x32xbf16, #tpu.memory_space<vmem>>, vector<1x128x32xbf16>
    %67 = vector.shape_cast %66 : vector<1x128x32xbf16> to vector<128x32xbf16>
    %c1_36 = arith.constant 1 : index
    %c0_37 = arith.constant 0 : index
    %c0_38 = arith.constant 0 : index
    %68 = vector.load %arg10[%c1_36, %c0_37, %c0_38] : memref<3x1x128xf32, #tpu.memory_space<vmem>>, vector<1x1x128xf32>
    %69 = vector.shape_cast %68 : vector<1x1x128xf32> to vector<1x128xf32>
    %70 = arith.truncf %58 : vector<8x32xf32> to vector<8x32xbf16>
    %cst_39 = arith.constant dense<0.000000e+00> : vector<8x128xf32>
    %71 = tpu.matmul %70, %65, %cst_39 {dimension_numbers = #tpu.dot_dimension_numbers<[1], [0], [0], [1], [0, 0, 1, 1], [], []>} : vector<8x32xbf16>, vector<32x128xbf16>, vector<8x128xf32> -> vector<8x128xf32>
    %72 = vector.broadcast %69 : vector<1x128xf32> to vector<8x128xf32>
    %73 = arith.subf %72, %71 : vector<8x128xf32>
    %cst_40 = arith.constant dense<0x7F800000> : vector<8xf32>
    %74 = vector.multi_reduction <minimumf>, %73, %cst_40 [1] : vector<8x128xf32> to vector<8xf32>
    %75 = vector.shape_cast %74 : vector<8xf32> to vector<8x1xf32>
    %76 = vector.broadcast %75 : vector<8x1xf32> to vector<8x128xf32>
    %77 = arith.cmpf ole, %73, %76 : vector<8x128xf32>
    %c128_i32_41 = arith.constant 128 : i32
    %78 = vector.broadcast %c128_i32_41 : i32 to vector<8x128xi32>
    %79 = arith.select %77, %31, %78 : vector<8x128xi1>, vector<8x128xi32>
    %cst_42 = arith.constant dense<2147483647> : vector<8xi32>
    %80 = vector.multi_reduction <minsi>, %79, %cst_42 [1] : vector<8x128xi32> to vector<8xi32>
    %81 = vector.shape_cast %80 : vector<8xi32> to vector<8x1xi32>
    %82 = vector.broadcast %81 : vector<8x1xi32> to vector<8x128xi32>
    %83 = arith.cmpi eq, %31, %82 : vector<8x128xi32>
    %84 = arith.extui %83 : vector<8x128xi1> to vector<8x128xi32>
    %85 = arith.sitofp %84 : vector<8x128xi32> to vector<8x128xf32>
    %86 = arith.truncf %85 : vector<8x128xf32> to vector<8x128xbf16>
    %cst_43 = arith.constant dense<0.000000e+00> : vector<8x32xf32>
    %87 = tpu.matmul %86, %67, %cst_43 {dimension_numbers = #tpu.dot_dimension_numbers<[1], [0], [0], [1], [0, 0, 1, 1], [], []>} : vector<8x128xbf16>, vector<128x32xbf16>, vector<8x32xf32> -> vector<8x32xf32>
    %88 = arith.subf %58, %87 : vector<8x32xf32>
    %c1_i32 = arith.constant 1 : i32
    %89 = vector.broadcast %c1_i32 : i32 to vector<8x3xi32>
    %90 = arith.cmpi eq, %32, %89 : vector<8x3xi32>
    %91 = vector.shape_cast %81 : vector<8x1xi32> to vector<8x1xi32>
    %92 = vector.broadcast %91 : vector<8x1xi32> to vector<8x3xi32>
    %93 = arith.select %90, %92, %63 : vector<8x3xi1>, vector<8x3xi32>
    %c2 = arith.constant 2 : index
    %c0_44 = arith.constant 0 : index
    %c0_45 = arith.constant 0 : index
    %94 = vector.load %arg8[%c2, %c0_44, %c0_45] : memref<3x32x128xbf16, #tpu.memory_space<vmem>>, vector<1x32x128xbf16>
    %95 = vector.shape_cast %94 : vector<1x32x128xbf16> to vector<32x128xbf16>
    %c2_46 = arith.constant 2 : index
    %c0_47 = arith.constant 0 : index
    %c0_48 = arith.constant 0 : index
    %96 = vector.load %arg10[%c2_46, %c0_47, %c0_48] : memref<3x1x128xf32, #tpu.memory_space<vmem>>, vector<1x1x128xf32>
    %97 = vector.shape_cast %96 : vector<1x1x128xf32> to vector<1x128xf32>
    %98 = arith.truncf %88 : vector<8x32xf32> to vector<8x32xbf16>
    %cst_49 = arith.constant dense<0.000000e+00> : vector<8x128xf32>
    %99 = tpu.matmul %98, %95, %cst_49 {dimension_numbers = #tpu.dot_dimension_numbers<[1], [0], [0], [1], [0, 0, 1, 1], [], []>} : vector<8x32xbf16>, vector<32x128xbf16>, vector<8x128xf32> -> vector<8x128xf32>
    %100 = vector.broadcast %97 : vector<1x128xf32> to vector<8x128xf32>
    %101 = arith.subf %100, %99 : vector<8x128xf32>
    %cst_50 = arith.constant dense<0x7F800000> : vector<8xf32>
    %102 = vector.multi_reduction <minimumf>, %101, %cst_50 [1] : vector<8x128xf32> to vector<8xf32>
    %103 = vector.shape_cast %102 : vector<8xf32> to vector<8x1xf32>
    %104 = vector.broadcast %103 : vector<8x1xf32> to vector<8x128xf32>
    %105 = arith.cmpf ole, %101, %104 : vector<8x128xf32>
    %c128_i32_51 = arith.constant 128 : i32
    %106 = vector.broadcast %c128_i32_51 : i32 to vector<8x128xi32>
    %107 = arith.select %105, %31, %106 : vector<8x128xi1>, vector<8x128xi32>
    %cst_52 = arith.constant dense<2147483647> : vector<8xi32>
    %108 = vector.multi_reduction <minsi>, %107, %cst_52 [1] : vector<8x128xi32> to vector<8xi32>
    %109 = vector.shape_cast %108 : vector<8xi32> to vector<8x1xi32>
    %c2_i32 = arith.constant 2 : i32
    %110 = vector.broadcast %c2_i32 : i32 to vector<8x3xi32>
    %111 = arith.cmpi eq, %32, %110 : vector<8x3xi32>
    %112 = vector.shape_cast %109 : vector<8x1xi32> to vector<8x1xi32>
    %113 = vector.broadcast %112 : vector<8x1xi32> to vector<8x3xi32>
    %114 = arith.select %111, %113, %93 : vector<8x3xi1>, vector<8x3xi32>
    %c0_53 = arith.constant 0 : index
    %c0_54 = arith.constant 0 : index
    %115 = vector.load %arg11[%c0_53, %c0_54] : memref<8x3xi32, #tpu.memory_space<vmem>>, vector<8x3xi32>
    tpu.vector_store %arg11[%c0_53, %c0_54], %114 {strides = array<i32>} : memref<8x3xi32, #tpu.memory_space<vmem>>, vector<8x3xi32>,
    return
  }
  func.func @transform_0(%arg0: i32) -> (i32, i32) {
    %c0_i32 = arith.constant 0 : i32
    %c0_i32_0 = arith.constant 0 : i32
    return %arg0, %c0_i32 : i32, i32
  }
  func.func @transform_1(%arg0: i32) -> (i32, i32) {
    %c0_i32 = arith.constant 0 : i32
    %c0_i32_0 = arith.constant 0 : i32
    %c0_i32_1 = arith.constant 0 : i32
    return %c0_i32, %c0_i32_0 : i32, i32
  }
  func.func @transform_2(%arg0: i32) -> (i32, i32) {
    %c0_i32 = arith.constant 0 : i32
    %c0_i32_0 = arith.constant 0 : i32
    %c0_i32_1 = arith.constant 0 : i32
    return %c0_i32, %c0_i32_0 : i32, i32
  }
  func.func @transform_3(%arg0: i32) -> (i32, i32) {
    %c0_i32 = arith.constant 0 : i32
    %c0_i32_0 = arith.constant 0 : i32
    %c0_i32_1 = arith.constant 0 : i32
    return %c0_i32, %c0_i32_0 : i32, i32
  }
  func.func @transform_4(%arg0: i32) -> (i32, i32) {
    %c0_i32 = arith.constant 0 : i32
    %c0_i32_0 = arith.constant 0 : i32
    %c0_i32_1 = arith.constant 0 : i32
    return %c0_i32, %c0_i32_0 : i32, i32
  }
  func.func @transform_5(%arg0: i32) -> (i32, i32) {
    %c0_i32 = arith.constant 0 : i32
    %c0_i32_0 = arith.constant 0 : i32
    %c0_i32_1 = arith.constant 0 : i32
    return %c0_i32, %c0_i32_0 : i32, i32
  }
  func.func @transform_6(%arg0: i32) -> (i32, i32) {
    %c0_i32 = arith.constant 0 : i32
    %c0_i32_0 = arith.constant 0 : i32
    %c0_i32_1 = arith.constant 0 : i32
    return %c0_i32, %c0_i32_0 : i32, i32
  }
  func.func @transform_7(%arg0: i32) -> (i32, i32, i32) {
    %c0_i32 = arith.constant 0 : i32
    %c0_i32_0 = arith.constant 0 : i32
    %c0_i32_1 = arith.constant 0 : i32
    %c0_i32_2 = arith.constant 0 : i32
    return %c0_i32, %c0_i32_0, %c0_i32_1 : i32, i32, i32
  }
  func.func @transform_8(%arg0: i32) -> (i32, i32, i32) {
    %c0_i32 = arith.constant 0 : i32
    %c0_i32_0 = arith.constant 0 : i32
    %c0_i32_1 = arith.constant 0 : i32
    %c0_i32_2 = arith.constant 0 : i32
    return %c0_i32, %c0_i32_0, %c0_i32_1 : i32, i32, i32
  }
  func.func @transform_9(%arg0: i32) -> (i32, i32, i32) {
    %c0_i32 = arith.constant 0 : i32
    %c0_i32_0 = arith.constant 0 : i32
    %c0_i32_1 = arith.constant 0 : i32
    %c0_i32_2 = arith.constant 0 : i32
    return %c0_i32, %c0_i32_0, %c0_i32_1 : i32, i32, i32
  }
  func.func @transform_10(%arg0: i32) -> (i32, i32) {
    %c0_i32 = arith.constant 0 : i32
    %c0_i32_0 = arith.constant 0 : i32
    return %arg0, %c0_i32 : i32, i32
  }
}

</mosaic_0001>

<bundles_post_ra>
// kernel: tpu_custom_call.1
= control target key start
LH: loop header
LB: loop body
LE: loop exit
PB: predicated region body
PF: predicated region fallthrough
CT: control target
= control target key end

     0   :  { %s1312_s13 = smov 0   ;;  %s1483_s0 = inlined_call_operand.vmem [shape: f32[16,64], index: 0, kind: input, shape index: {}]   ;;  %s1484_s1 = inlined_call_operand.vmem [shape: bf16[64,128], index: 1, kind: input, shape index: {}]   ;;  %s1485_s2 = inlined_call_operand.vmem [shape: f32[1,128], index: 2, kind: input, shape index: {}]   ;;  %s1486_s3 = inlined_call_operand.vmem [shape: bf16[128,64], index: 3, kind: input, shape index: {}]   ;;  %s1487_s4 = inlined_call_operand.vmem [shape: f32[1,64], index: 4, kind: input, shape index: {}]   ;;  %s1488_s5 = inlined_call_operand.vmem [shape: bf16[64,32], index: 5, kind: input, shape index: {}]   ;;  %s1489_s6 = inlined_call_operand.vmem [shape: f32[1,32], index: 6, kind: input, shape index: {}]   ;;  %s1490_s7 = inlined_call_operand.vmem [shape: bf16[3,32,128], index: 7, kind: input, shape index: {}]   ;;  %s1491_s8 = inlined_call_operand.vmem [shape: bf16[3,128,32], index: 8, kind: input, shape index: {}]   ;;  %s1492_s9 = inlined_call_operand.vmem [shape: f32[3,1,128], index: 9, kind: input, shape index: {}]   ;;  %s1493_s10 = inlined_call_operand.vmem [shape: s32[16,3], index: 10, kind: output, shape index: {}]  }
   0x1 LB: > { %s987_s14 = sadd.s32 4294967295, %s1254_s13   ;;  %p991_p0 = scmp.ge.s32.totalorder %s1254_s13, 1  ;;  %s1254_s13 = sphi %s1312_s13, %s20_s13  }
   0x2   : > { %p311_p1 = scmp.lt.s32.totalorder %s1254_s13, 3 }
   0x4   : > { %p312_p2 = pnand %p991_p0, %p311_p1 }
   0x5   : > { %p347_p3 = scmp.lt.s32.totalorder (!%p312_p2), %s987_s14, 1 }
   0x6   : > { %315 = sbr.rel (%p312_p2) target bundleno = 2231 (0x8b7), region = 60 }
   0xb   : > { %v1190_v0 = vld [vmem:[%s1484_s1 + $0x18] sm:$0xff]  ;;  %v1189_v1 = vld [vmem:[%s1484_s1 + $0x10] sm:$0xff]  ;;  %s1495_s14 = smov (!%p347_p3, %s987_s14), 1  ;;  %v1188_v2 = vld [vmem:[%s1484_s1 + $0x8] sm:$0xff]  ;;  %vm394_vm0 = vcmask 523264   ;;  %vm622_vm9 = vcmask 261120  }
   0xc   : > { %402 = vmatpush.bf16.msra.mxu0 %v1190_v0  ;;  %s992_s19 = sshll.u32 %s1495_s14, 3  ;;  %v1187_v3 = vld [vmem:[%s1484_s1] sm:$0xff]  ;;  %v1198_v6 = vld [vmem:[%s1486_s3 + $0x38] sm:$0xff]  ;;  %v1197_v7 = vld [vmem:[%s1486_s3 + $0x30] sm:$0xff] }
   0xd   : > { %s350_s24 = scalar_lea.vmem %s1483_s0, %s992_s19  ;;  %500 = vmatpush.bf16.msra.mxu1 %v1198_v6  ;;  %v1196_v8 = vld [vmem:[%s1486_s3 + $0x28] sm:$0xff]  ;;  %v1195_v9 = vld [vmem:[%s1486_s3 + $0x20] sm:$0xff]  ;;  %v1194_v10 = vld [vmem:[%s1486_s3 + $0x18] sm:$0xff] }
   0xe   : > { %v356_v4 = vld [vmem:[%s350_s24] sm:$0xff]  ;;  %v1193_v11 = vld [vmem:[%s1486_s3 + $0x10] sm:$0xff]  ;;  %v1192_v12 = vld [vmem:[%s1486_s3 + $0x8] sm:$0xff]  ;;  %s354_s24 = scalar_lea.vmem %s1493_s10, %s992_s19 }
   0xf   : > { %v357_v5 = vpack.c.bf16 %v356_v4, %v356_v4  ;;  %v1191_v13 = vld [vmem:[%s1486_s3] sm:$0xff]  ;;  %v1202_v33 = vld [vmem:[%s1488_s5 + $0x18] sm:$0xff]  ;;  %v1201_v34 = vld [vmem:[%s1488_s5 + $0x10] sm:$0xff] }
  0x10   : > { %403 = vmatpush.bf16.msra.mxu0 %v1189_v1  ;;  %v1234_v14 = vld [vmem:[%s1485_s2] ss:$0 sm:$0xff]  ;;  %577 = vmatpush.bf16.msra.mxu2 %v1202_v33  ;;  %v1200_v35 = vld [vmem:[%s1488_s5 + $0x8] sm:$0xff]  ;;  %v1238_v33 = vld [vmem:[%s1492_s9 + $0x1] ss:$0 sm:$0xff] }
  0x11   : > { %501 = vmatpush.bf16.msra.mxu1 %v1197_v7  ;;  %v1235_v36 = vld [vmem:[%s1487_s4] ss:$0 sm:$0xff]  ;;  %v1204_v41 = vld [vmem:[%s1490_s7 + $0x8] sm:$0xff] }
  0x12   : > { %v1199_v37 = vld [vmem:[%s1488_s5] sm:$0xff]  ;;  %632 = vmatpush.bf16.msra.mxu3 %v1204_v41  ;;  %v1222_v41 = vld [vmem:[%s1491_s8 + $0x78] sm:$0xff] }
  0x13   : > { %v1203_v57 = vld [vmem:[%s1490_s7] sm:$0xff] }
  0x14   : > { %404 = vmatpush.bf16.msra.mxu0 %v1188_v2  ;;  %578 = vmatpush.bf16.msra.mxu2 %v1201_v34  ;;  %v1236_v58 = vld [vmem:[%s1489_s6] ss:$0 sm:$0xff] }
  0x15   : > { %502 = vmatpush.bf16.msra.mxu1 %v1196_v8  ;;  %v1237_v63 = vld [vmem:[%s1492_s9] ss:$0 sm:$0xff] }
  0x16   : > { %633 = vmatpush.bf16.msra.mxu3 %v1203_v57 }
  0x18   : > { %405 = vmatpush.bf16.msra.mxu0 %v1187_v3  ;;  %579 = vmatpush.bf16.msra.mxu2 %v1200_v35  ;;  %v586_v3 = vlaneseq }
  0x19   : > { %503 = vmatpush.bf16.msra.mxu1 %v1195_v9  ;;  %v1212_v9 = vld [vmem:[%s1491_s8 + $0x38] sm:$0xff] }
  0x1a   : > { %v1397_v4 = vand.u32 127, %v586_v3  ;;  %713 = vmatpush.bf16.msrb.mxu3 %v1212_v9 }
  0x1b   : > { %1010 = vmatmul.msk.bf16.vlgmr.msra.gmra.mxu0 %vm394_vm0, %v357_v5 }
  0x1c   : > { %580 = vmatpush.bf16.msra.mxu2 %v1199_v37 }
  0x1d   : > { %504 = vmatpush.bf16.msra.mxu1 %v1194_v10  ;;  %v1211_v10 = vld [vmem:[%s1491_s8 + $0x30] sm:$0xff] }
  0x1e   : > { %714 = vmatpush.bf16.msrb.mxu3 %v1211_v10 }
  0x20   : > { %856 = vmatpush.bf16.msrb.mxu2 %v1222_v41 }
  0x21   : > { %505 = vmatpush.bf16.msra.mxu1 %v1193_v11  ;;  %v1210_v11 = vld [vmem:[%s1491_s8 + $0x28] sm:$0xff] }
  0x22   : > { %715 = vmatpush.bf16.msrb.mxu3 %v1210_v11 }
  0x25   : > { %506 = vmatpush.bf16.msra.mxu1 %v1192_v12  ;;  %v1209_v12 = vld [vmem:[%s1491_s8 + $0x20] sm:$0xff] }
  0x26   : > { %716 = vmatpush.bf16.msrb.mxu3 %v1209_v12 }
  0x29   : > { %507 = vmatpush.bf16.msra.mxu1 %v1191_v13  ;;  %v1208_v13 = vld [vmem:[%s1491_s8 + $0x18] sm:$0xff] }
  0x2a   : > { %717 = vmatpush.bf16.msrb.mxu3 %v1208_v13 }
  0x98   : > { %v407_v15 = vpop.f32.mrf.mxu0 }
  0x99   : > { %v408_v16 = vadd.f32 %v1234_v14, %v407_v15  ;;  %v1207_v14 = vld [vmem:[%s1491_s8 + $0x10] sm:$0xff]  ;;  %v1206_v15 = vld [vmem:[%s1491_s8 + $0x8] sm:$0xff] }
  0x9a   : > { %718 = vmatpush.bf16.msrb.mxu3 %v1207_v14 }
  0x9b   : > { %v1011_v17 = vmul.f32 -1.442695, %v408_v16 }
  0x9d   : > { %1240 = vpow2.f32 %v1011_v17 }
  0x9e   : > { %719 = vmatpush.bf16.msrb.mxu3 %v1206_v15 }
  0xa0   : > { %v409_v18 = vpop.f32.mrf.mxu0 }
  0xa3   : > { %v1241_v19 = vpop.eup %1240 }
  0xa4   : > { %v414_v20 = vadd.f32 1.0, %v1241_v19 }
  0xa6   : > { %1242 = vrcp.f32 %v414_v20  ;;  %v426_v24 = vand.u32 2147483648, %v414_v20  ;;  %v424_v26 = vand.u32 2147483647, %v414_v20  ;;  %vm420_vm2 = vweird.f32 %v414_v20 }
  0xa8   : > { %v427_v28 = vor.u32 1.1754944e-38, %v426_v24  ;;  %vm425_vm4 = vcmp.eq.f32.partialorder %v424_v26, 8.507059e+37 }
  0xac   : > { %v1243_v21 = vpop.eup %1242 }
  0xad   : > { %v416_v22 = vmul.f32 %v1243_v21, %v414_v20  ;;  %vm421_vm1 = vweird.f32 %v1243_v21  ;;  %v1205_v20 = vld [vmem:[%s1491_s8] sm:$0xff] }
  0xae   : > { %vm422_vm3 = vmor %vm420_vm2, %vm421_vm1  ;;  %720 = vmatpush.bf16.msrb.mxu3 %v1205_v20  ;;  %vm870_vm1 = vcmp.eq.s32.totalorder %v1397_v4, 1 }
  0xaf   : > { %v417_v23 = vsub.f32 1.0, %v416_v22  ;;  %v1213_v22 = vld [vmem:[%s1490_s7 + $0x10] sm:$0xff] }
  0xb1   : > { %v418_v25 = vmul.f32 %v1243_v21, %v417_v23 }
  0xb3   : > { %v419_v27 = vadd.f32 %v1243_v21, %v418_v25 }
  0xb5   : > { %v423_v29 = vsel %vm422_vm3, %v1243_v21, %v419_v27  ;;  %v1214_v21 = vld [vmem:[%s1490_s7 + $0x18] sm:$0xff] }
  0xb6   : > { %v428_v30 = vsel %vm425_vm4, %v427_v28, %v423_v29  ;;  %775 = vmatpush.bf16.msrb.mxu0 %v1214_v21  ;;  %v1256_v28 = vmov 1.0|1.0  }
  0xb7   : > { %v430_v31 = vmul.f32 %v428_v30, %v408_v16 }
  0xb9   : > { %v431_v32 = vpack.c.bf16 %v430_v31, %v430_v31 }
  0xba   : > { %776 = vmatpush.bf16.msrb.mxu0 %v1213_v22 }
  0xbb   : > { %508 = vmatmul.bf16.vlgmr.msra.gmra.mxu1 %v431_v32 }
 0x138   : > { %v509_v38 = vpop.f32.mrf.mxu1 }
 0x139   : > { %v510_v39 = vadd.f32 %v1235_v36, %v509_v38 }
 0x13b   : > { %v1044_v40 = vmul.f32 -1.442695, %v510_v39 }
 0x13d   : > { %1244 = vpow2.f32 %v1044_v40 }
 0x140   : > { %v511_v42 = vpop.f32.mrf.mxu1 }
 0x141   : > { %v1221_v42 = vld [vmem:[%s1491_s8 + $0x70] sm:$0xff] }
 0x142   : > { %857 = vmatpush.bf16.msrb.mxu2 %v1221_v42 }
 0x143   : > { %v1245_v43 = vpop.eup %1244 }
 0x144   : > { %v516_v44 = vadd.f32 1.0, %v1245_v43  ;;  %v1220_v43 = vld [vmem:[%s1491_s8 + $0x68] sm:$0xff] }
 0x146   : > { %1246 = vrcp.f32 %v516_v44  ;;  %v528_v48 = vand.u32 2147483648, %v516_v44  ;;  %v526_v50 = vand.u32 2147483647, %v516_v44  ;;  %vm522_vm6 = vweird.f32 %v516_v44  ;;  %858 = vmatpush.bf16.msrb.mxu2 %v1220_v43 }
 0x148   : > { %v529_v52 = vor.u32 1.1754944e-38, %v528_v48  ;;  %vm527_vm8 = vcmp.eq.f32.partialorder %v526_v50, 8.507059e+37 }
 0x14c   : > { %v1247_v45 = vpop.eup %1246 }
 0x14d   : > { %v518_v46 = vmul.f32 %v1247_v45, %v516_v44  ;;  %vm523_vm5 = vweird.f32 %v1247_v45  ;;  %v1219_v44 = vld [vmem:[%s1491_s8 + $0x60] sm:$0xff] }
 0x14e   : > { %vm524_vm7 = vmor %vm522_vm6, %vm523_vm5  ;;  %859 = vmatpush.bf16.msrb.mxu2 %v1219_v44  ;;  %vm930_vm6 = vcmp.eq.s32.totalorder %v1397_v4, 2 }
 0x14f   : > { %v519_v47 = vsub.f32 1.0, %v518_v46  ;;  %v1217_v46 = vld [vmem:[%s1491_s8 + $0x50] sm:$0xff] }
 0x151   : > { %v520_v49 = vmul.f32 %v1247_v45, %v519_v47  ;;  %v1216_v47 = vld [vmem:[%s1491_s8 + $0x48] sm:$0xff] }
 0x153   : > { %v521_v51 = vadd.f32 %v1247_v45, %v520_v49 }
 0x155   : > { %v525_v53 = vsel %vm524_vm7, %v1247_v45, %v521_v51  ;;  %v1218_v45 = vld [vmem:[%s1491_s8 + $0x58] sm:$0xff]  ;;  %vm932_vm7 = vcmask 23552  }
 0x156   : > { %v530_v54 = vsel %vm527_vm8, %v529_v52, %v525_v53  ;;  %860 = vmatpush.bf16.msrb.mxu2 %v1218_v45  ;;  %v1215_v52 = vld [vmem:[%s1491_s8 + $0x40] sm:$0xff]  ;;  %v1224_v53 = vld [vmem:[%s1490_s7 + $0x28] sm:$0xff] }
 0x157   : > { %v532_v55 = vmul.f32 %v530_v54, %v510_v39  ;;  %901 = vmatpush.bf16.msra.mxu0 %v1224_v53  ;;  %v1223_v54 = vld [vmem:[%s1490_s7 + $0x20] sm:$0xff] }
 0x159   : > { %v533_v56 = vpack.c.bf16 %v532_v55, %v532_v55 }
 0x15a   : > { %861 = vmatpush.bf16.msrb.mxu2 %v1217_v46 }
 0x15b   : > { %1061 = vmatmul.msk.bf16.vlgmr.msra.gmra.mxu2 %vm394_vm0, %v533_v56  ;;  %902 = vmatpush.bf16.msra.mxu0 %v1223_v54  ;;  %vm727_vm0 = vcmp.eq.s32.totalorder %v1397_v4, 0 }
 0x15e   : > { %862 = vmatpush.bf16.msrb.mxu2 %v1216_v47 }
 0x162   : > { %863 = vmatpush.bf16.msrb.mxu2 %v1215_v52 }
 0x1de   : > { %v582_v59 = vpop.f32.mrf.mxu2 }
 0x1df   : > { %v583_v60 = vadd.f32 %v1236_v58, %v582_v59 }
 0x1e1   : > { %v609_v61 = vpack.c.bf16 %v583_v60, %v583_v60 }
 0x1e3   : > { %1070 = vmatmul.msk.bf16.vlgmr.msra.gmra.mxu3 %vm622_vm9, %v609_v61 }
 0x1e6   : > { %v584_v62 = vpop.f32.mrf.mxu2 }
 0x266   : > { %v635_v0 = vpop.f32.mrf.mxu3 }
 0x267   : > { %v642_v1 = vsub.f32 %v1237_v63, %v635_v0 }
 0x269   : > { %643 = vmin.xlane.f32.xlu0 %v642_v1 }
 0x26e   : > { %v637_v2 = vpop.f32.mrf.mxu3 }
 0x26f   : > { %v1239_v2 = vld [vmem:[%s1492_s9 + $0x2] ss:$0 sm:$0xff] }
 0x2dc   : > { %v644_v5 = vpop.xlane.xlu0 %643 }
 0x2dd   : > { %vm645_vm10 = vcmp.le.f32.partialorder %v642_v1, %v644_v5 }
 0x2de   : > { %v646_v6 = vsel %vm645_vm10, %v1397_v4, 128 }
 0x2df   : > { %v648_v7 = vshra.s32 %v646_v6, 16  ;;  %v647_v16 = vand.u32 65535, %v646_v6 }
 0x2e1   : > { %v650_v8 = vcvt.s32.f32 %v648_v7  ;;  %v649_v18 = vcvt.s32.f32 %v647_v16 }
 0x2e3   : > { %651 = vmin.xlane.f32.xlu0 %v650_v8 }
 0x356   : > { %v652_v17 = vpop.xlane.xlu0 %651 }
 0x357   : > { %vm653_vm11 = vcmp.eq.f32.partialorder %v650_v8, %v652_v17  ;;  %v658_v23 = vcvt.f32.s32 %v652_v17 }
 0x358   : > { %v654_v19 = vsel %vm653_vm11, %v649_v18, inf }
 0x359   : > { %655 = vmin.xlane.f32.xlu1 %v654_v19  ;;  %v659_v25 = vshll.u32 %v658_v23, 16 }
 0x3cc   : > { %v656_v24 = vpop.xlane.xlu1 %655 }
 0x3cd   : > { %v657_v26 = vcvt.f32.s32 %v656_v24 }
 0x3cf   : > { %v660_v27 = vadd.s32 %v659_v25, %v657_v26 }
 0x3d1   : > { %vm661_vm12 = vcmp.eq.s32.totalorder %v1397_v4, %v660_v27 }
 0x3d2   : > { %vm1104_vm13 = vmpackc.low %vm661_vm12, %vm661_vm12 }
 0x3d3   : > { %1105 = vmatmul.msk.bf16.vlgmr.msrb.gmra.mxu3 %vm1104_vm13, %v1256_v28 }
 0x456   : > { %v722_v29 = vpop.f32.mrf.mxu3 }
 0x457   : > { %v726_v30 = vsub.f32 %v583_v60, %v722_v29  ;;  %v728_v60 = vsel %vm727_vm0, %v660_v27, 0 }
 0x459   : > { %v753_v31 = vpack.c.bf16 %v726_v30, %v726_v30 }
 0x45b   : > { %1135 = vmatmul.msk.bf16.vlgmr.msrb.gmra.mxu0 %vm622_vm9, %v753_v31 }
 0x45e   : > { %v724_v32 = vpop.f32.mrf.mxu3 }
 0x4d8   : > { %v778_v34 = vpop.f32.mrf.mxu0 }
 0x4d9   : > { %v785_v35 = vsub.f32 %v1238_v33, %v778_v34 }
 0x4db   : > { %786 = vmin.xlane.f32.xlu1 %v785_v35 }
 0x4e0   : > { %v780_v36 = vpop.f32.mrf.mxu0 }
 0x54e   : > { %v787_v37 = vpop.xlane.xlu1 %786 }
 0x54f   : > { %vm788_vm14 = vcmp.le.f32.partialorder %v785_v35, %v787_v37 }
 0x550   : > { %v789_v38 = vsel %vm788_vm14, %v1397_v4, 128 }
 0x551   : > { %v791_v39 = vshra.s32 %v789_v38, 16  ;;  %v790_v48 = vand.u32 65535, %v789_v38 }
 0x553   : > { %v793_v40 = vcvt.s32.f32 %v791_v39  ;;  %v792_v50 = vcvt.s32.f32 %v790_v48 }
 0x555   : > { %794 = vmin.xlane.f32.xlu2 %v793_v40 }
 0x5c8   : > { %v795_v49 = vpop.xlane.xlu2 %794 }
 0x5c9   : > { %vm796_vm15 = vcmp.eq.f32.partialorder %v793_v40, %v795_v49  ;;  %v801_v55 = vcvt.f32.s32 %v795_v49 }
 0x5ca   : > { %v797_v51 = vsel %vm796_vm15, %v792_v50, inf }
 0x5cb   : > { %798 = vmin.xlane.f32.xlu2 %v797_v51  ;;  %v802_v57 = vshll.u32 %v801_v55, 16 }
 0x63e   : > { %v799_v56 = vpop.xlane.xlu2 %798 }
 0x63f   : > { %v800_v58 = vcvt.f32.s32 %v799_v56 }
 0x641   : > { %v803_v59 = vadd.s32 %v802_v57, %v800_v58 }
 0x643   : > { %v871_v61 = vsel %vm870_vm1, %v803_v59, %v728_v60  ;;  %vm804_vm2 = vcmp.eq.s32.totalorder %v1397_v4, %v803_v59 }
 0x644   : > { %vm1169_vm3 = vmpackc.low %vm804_vm2, %vm804_vm2 }
 0x645   : > { %1170 = vmatmul.msk.bf16.vlgmr.msrb.gmra.mxu2 %vm1169_vm3, %v1256_v28 }
 0x6c8   : > { %v865_v62 = vpop.f32.mrf.mxu2 }
 0x6c9   : > { %v869_v63 = vsub.f32 %v726_v30, %v865_v62 }
 0x6cb   : > { %v879_v0 = vpack.c.bf16 %v869_v63, %v869_v63 }
 0x6cd   : > { %1184 = vmatmul.msk.bf16.vlgmr.msra.gmra.mxu0 %vm622_vm9, %v879_v0 }
 0x6d0   : > { %v867_v1 = vpop.f32.mrf.mxu2 }
 0x74a   : > { %v904_v3 = vpop.f32.mrf.mxu0 }
 0x74b   : > { %v911_v5 = vsub.f32 %v1239_v2, %v904_v3 }
 0x74d   : > { %912 = vmin.xlane.f32.xlu0 %v911_v5 }
 0x752   : > { %v906_v6 = vpop.f32.mrf.mxu0 }
 0x7c0   : > { %v913_v7 = vpop.xlane.xlu0 %912 }
 0x7c1   : > { %vm914_vm4 = vcmp.le.f32.partialorder %v911_v5, %v913_v7 }
 0x7c2   : > { %v915_v8 = vsel %vm914_vm4, %v1397_v4, 128 }
 0x7c3   : > { %v917_v9 = vshra.s32 %v915_v8, 16  ;;  %v916_v11 = vand.u32 65535, %v915_v8 }
 0x7c5   : > { %v919_v10 = vcvt.s32.f32 %v917_v9  ;;  %v918_v13 = vcvt.s32.f32 %v916_v11 }
 0x7c7   : > { %920 = vmin.xlane.f32.xlu1 %v919_v10 }
 0x83a   : > { %v921_v12 = vpop.xlane.xlu1 %920 }
 0x83b   : > { %vm922_vm5 = vcmp.eq.f32.partialorder %v919_v10, %v921_v12  ;;  %v927_v15 = vcvt.f32.s32 %v921_v12 }
 0x83c   : > { %v923_v14 = vsel %vm922_vm5, %v918_v13, inf }
 0x83d   : > { %924 = vmin.xlane.f32.xlu2 %v923_v14  ;;  %v928_v17 = vshll.u32 %v927_v15, 16 }
 0x8b0   : > { %v925_v16 = vpop.xlane.xlu2 %924 }
 0x8b1   : > { %v926_v18 = vcvt.f32.s32 %v925_v16 }
 0x8b3   : > { %v929_v19 = vadd.s32 %v928_v17, %v926_v18 }
 0x8b5   : > { %v931_v20 = vsel %vm930_vm6, %v929_v19, %v871_v61 }
 0x8b6   : > { %933 = vst.msk [vmem:[%s354_s24] sm:$0xff] %vm932_vm7, %v931_v20 }
 0x8b7 PF: > { %s20_s13 = sadd.s32 1, %s1254_s13  }
 0x8b8   : > { %p17_p4 = scmp.ge.s32.totalorder %s20_s13, 4  }
 0x8ba   :  { %19 = sbr.rel (!%p17_p4) target bundleno = 1 (0x1), region = 95 }

</bundles_post_ra>
